<compile_context>
chip_gen: v7x
topology: tpu7x:2x2x1
jax: 0.10.0
libtpu: 0.0.40
codegen_flags: <defaults>
</compile_context>

<pallas_src>
import functools
import math

import jax
import jax.numpy as jnp
from jax import lax
from jax.experimental import pallas as pl
from jax.experimental.pallas import tpu as pltpu


_NEG_BIG = -1.0e30   # finite mask value for padded logits columns (no NaNs)
_BIG_COL = 2 ** 30   # "no argmax yet" sentinel column index


def _ce_pass_kernel(nvalid_ref, scale_ref, a_ref, b_ref, d_ref, *refs,
                    compute_acc):
    """One row-tiled online-LSE cross-entropy pass.

    For row tile i / column tile j of logits = (scale * a) @ b.T (bf16 MXU,
    f32 accumulation), updates the online log-sum-exp over columns, the
    diagonal logit (label == row index) and, optionally, the running argmax.

    refs layout:
      compute_acc: ce_ref, corr_ref, a_s_scr, m_scr, l_scr, diag_scr, arg_scr
      else       : ce_ref,           a_s_scr, m_scr, l_scr, diag_scr, arg_scr
    """
    if compute_acc:
        ce_ref, corr_ref = refs[0], refs[1]
        a_s_scr, m_scr, l_scr, diag_scr, arg_scr = refs[2:]
    else:
        ce_ref, corr_ref = refs[0], None
        a_s_scr, m_scr, l_scr, diag_scr, arg_scr = refs[1:]

    i = pl.program_id(0)
    j = pl.program_id(1)
    n_col_tiles = pl.num_programs(1)

    tm = a_ref.shape[0]
    tn = b_ref.shape[0]
    n_valid = nvalid_ref[0]

    # ---- init per row tile (first column tile) -----------------------------
    @pl.when(j == 0)
    def _init():
        scale = scale_ref[0]
        # Fold logit_scale into the lhs tile once per row tile: O(TM*D).
        a_s = (a_ref[...].astype(jnp.float32) * scale).astype(a_ref.dtype)
        a_s_scr[...] = a_s
        # Diagonal logits (label == row index): O(TM*D) lane reduction.
        diag_scr[...] = jnp.sum(
            a_s.astype(jnp.float32) * d_ref[...].astype(jnp.float32),
            axis=1, keepdims=True)
        m_scr[...] = jnp.full_like(m_scr, _NEG_BIG)
        l_scr[...] = jnp.zeros_like(l_scr)
        if compute_acc:
            arg_scr[...] = jnp.full_like(arg_scr, _BIG_COL)

    # ---- (TM, TN) logits tile on the MXU (bf16 in, f32 accumulate) ---------
    s = jnp.dot(a_s_scr[...], b_ref[...].T,
                preferred_element_type=jnp.float32)              # (tm, tn)

    col_idx = j * tn + lax.broadcasted_iota(jnp.int32, (tm, tn), 1)
    col_ok = col_idx < n_valid
    s = jnp.where(col_ok, s, _NEG_BIG)                           # mask padding

    # ---- online log-sum-exp (single exp sweep per pass) --------------------
    m_prev = m_scr[...]                                          # (tm, 1)
    tile_max = jnp.max(s, axis=1, keepdims=True)                 # (tm, 1)
    m_new = jnp.maximum(m_prev, tile_max)
    p = jnp.exp(s - m_new)                                       # (tm, tn)
    alpha = jnp.exp(m_prev - m_new)                              # (tm, 1)
    l_scr[...] = alpha * l_scr[...] + jnp.sum(p, axis=1, keepdims=True)

    # ---- fused running argmax (first occurrence, torch.argmax semantics) ---
    if compute_acc:
        cand = jnp.where((s == tile_max) & col_ok, col_idx, _BIG_COL)
        tile_arg = jnp.min(cand, axis=1, keepdims=True)          # (tm, 1) i32
        arg_scr[...] = jnp.where(tile_max > m_prev, tile_arg, arg_scr[...])

    m_scr[...] = m_new

    # ---- finalize per row tile (last column tile) --------------------------
    @pl.when(j == n_col_tiles - 1)
    def _finalize():
        row_idx = i * tm + lax.broadcasted_iota(jnp.int32, (tm, 1), 0)
        row_ok = row_idx < n_valid
        lse = m_scr[...] + jnp.log(l_scr[...])
        ce_ref[...] = jnp.where(row_ok, lse - diag_scr[...], 0.0)
        if compute_acc:
            correct = (arg_scr[...] == row_idx) & row_ok
            corr_ref[...] = correct.astype(jnp.float32)


def _online_ce_pass(a, b, d, n_valid, scale, *, tm, tn, compute_acc):
    """Row-tiled CE pass for logits = (scale * a) @ b.T.

    a, b, d: (n_pad, d_pad) bf16; d is the same tensor as b but tiled by row
    index (supplies the diagonal).  Returns per-row CE contributions
    (n_pad, 1) and, if compute_acc, per-row correct flags (n_pad, 1).
    """
    n_pad, d_pad = a.shape
    grid = (n_pad // tm, n_pad // tn)

    nv = jnp.full((1,), n_valid, dtype=jnp.int32)
    sc = jnp.reshape(jnp.asarray(scale, dtype=jnp.float32), (1,))

    in_specs = [
        pl.BlockSpec(memory_space=pltpu.SMEM),                # n_valid
        pl.BlockSpec(memory_space=pltpu.SMEM),                # logit_scale
        pl.BlockSpec((tm, d_pad), lambda i, j: (i, 0)),       # a (row tiles)
        pl.BlockSpec((tn, d_pad), lambda i, j: (j, 0)),       # b (col tiles)
        pl.BlockSpec((tm, d_pad), lambda i, j: (i, 0)),       # d (diag rows)
    ]
    out_shape = [jax.ShapeDtypeStruct((n_pad, 1), jnp.float32)]
    out_specs = [pl.BlockSpec((tm, 1), lambda i, j: (i, 0))]
    if compute_acc:
        out_shape.append(jax.ShapeDtypeStruct((n_pad, 1), jnp.float32))
        out_specs.append(pl.BlockSpec((tm, 1), lambda i, j: (i, 0)))

    scratch_shapes = [
        pltpu.VMEM((tm, d_pad), a.dtype),     # scale-folded lhs row tile
        pltpu.VMEM((tm, 1), jnp.float32),     # running row max m
        pltpu.VMEM((tm, 1), jnp.float32),     # running exp-sum l
        pltpu.VMEM((tm, 1), jnp.float32),     # diagonal logits
        pltpu.VMEM((tm, 1), jnp.int32),       # running argmax column
    ]

    itemsize = jnp.dtype(a.dtype).itemsize
    cost = pl.CostEstimate(
        flops=int(2 * n_pad * n_pad * d_pad + 8 * n_pad * n_pad),
        transcendentals=int(n_pad * n_pad + n_pad * grid[1] + n_pad),
        bytes_accessed=int(2 * n_pad * d_pad * itemsize            # a + d
                           + grid[0] * n_pad * d_pad * itemsize    # b re-streamed
                           + len(out_shape) * n_pad * 4),
    )

    outs = pl.pallas_call(
        functools.partial(_ce_pass_kernel, compute_acc=compute_acc),
        grid=grid,
        in_specs=in_specs,
        out_specs=tuple(out_specs),
        out_shape=tuple(out_shape),
        scratch_shapes=scratch_shapes,
        compiler_params=pltpu.CompilerParams(
            dimension_semantics=("parallel", "arbitrary"),
            vmem_limit_bytes=32 * 1024 * 1024),
        cost_estimate=cost,
    )(nv, sc, a, b, d)

    if compute_acc:
        return outs[0], outs[1]
    return outs[0], None


def _round_up(x, m):
    return ((x + m - 1) // m) * m


def clip_loss_pallas(image_embed, text_embed, logit_scale, *, tm=256, tn=256):
    """Single-device CLIPLoss forward. Returns dict like the PyTorch module."""
    n, d_dim = image_embed.shape
    assert text_embed.shape == (n, d_dim)

    # Tile sizes: multiples of 16 (bf16 sublane packing); clamp for small N.
    # For real CLIP sizes keep tm/tn multiples of 256 (v6e MXU) / 128 (v5e).
    tm = max(16, min(tm, _round_up(n, 16)))
    tn = max(16, min(tn, _round_up(n, 16)))
    assert tm % 16 == 0 and tn % 16 == 0

    n_pad = _round_up(n, (tm * tn) // math.gcd(tm, tn))
    d_pad = _round_up(d_dim, 128)     # lane-aligned embedding dim

    def prep(x):
        x = jnp.pad(x.astype(jnp.float32),
                    ((0, n_pad - n), (0, d_pad - d_dim)))
        return x.astype(jnp.bfloat16)  # bf16 MXU inputs, f32 accumulation

    img = prep(image_embed)
    txt = prep(text_embed)

    # Image-side CE + accuracy: logits_per_image = scale * img @ txt.T
    ce_img, corr = _online_ce_pass(img, txt, txt, n, logit_scale,
                                   tm=tm, tn=tn, compute_acc=True)
    # Text-side CE (second row-wise pass): logits_per_text = scale * txt @ img.T
    ce_txt, _ = _online_ce_pass(txt, img, img, n, logit_scale,
                                tm=tm, tn=tn, compute_acc=False)

    inv_n = 1.0 / n
    loss = 0.5 * (jnp.sum(ce_img) + jnp.sum(ce_txt)) * inv_n
    acc = 100.0 * jnp.sum(corr) * inv_n
    return {"loss": loss, "clip_loss": loss, "clip_acc": acc}


def _clip_loss_ref(image_embed, text_embed, logit_scale):
    """Pure-JAX reference mirroring the kernel's bf16 / scale-folding numerics."""
    scale = jnp.asarray(logit_scale, jnp.float32)
    img = image_embed.astype(jnp.bfloat16)
    txt = text_embed.astype(jnp.bfloat16)
    img_s = (img.astype(jnp.float32) * scale).astype(jnp.bfloat16)
    txt_s = (txt.astype(jnp.float32) * scale).astype(jnp.bfloat16)
    logits_per_image = jnp.dot(img_s, txt.T, preferred_element_type=jnp.float32)
    logits_per_text = jnp.dot(txt_s, img.T, preferred_element_type=jnp.float32)

    n = logits_per_image.shape[0]
    labels = jnp.arange(n)

    def ce(logits):
        logp = jax.nn.log_softmax(logits, axis=-1)
        return -jnp.mean(logp[labels, labels])

    loss = 0.5 * (ce(logits_per_image) + ce(logits_per_text))
    pred = jnp.argmax(logits_per_image, axis=-1)
    acc = 100.0 * jnp.sum(pred == labels) / n
    return loss, acc.astype(jnp.float32)


if __name__ == "__main__":
    key = jax.random.PRNGKey(0)
    k1, k2 = jax.random.split(key)
    # Small demo shapes; exercises N-padding (24 -> 32), D-padding (96 -> 128)
    # and a 2x2 (row-tile, col-tile) grid with tm = tn = 16.
    N, D = 24, 96

    image_embed = jax.random.normal(k1, (N, D), dtype=jnp.float32)
    text_embed = jax.random.normal(k2, (N, D), dtype=jnp.float32)
    image_embed = image_embed / jnp.linalg.norm(image_embed, axis=-1, keepdims=True)
    text_embed = text_embed / jnp.linalg.norm(text_embed, axis=-1, keepdims=True)
    logit_scale = jnp.exp(jnp.float32(2.659260036932778))  # exp(ln(1/0.07))

    out = clip_loss_pallas(image_embed, text_embed, logit_scale, tm=16, tn=16)
    jax.block_until_ready(out["loss"])
    jax.block_until_ready(out["clip_acc"])

    ref_loss, ref_acc = _clip_loss_ref(image_embed, text_embed, logit_scale)
    assert jnp.allclose(out["loss"], ref_loss, rtol=1e-3, atol=1e-3), (out["loss"], ref_loss)
    assert jnp.allclose(out["clip_acc"], ref_acc, rtol=1e-3, atol=1e-3), (out["clip_acc"], ref_acc)

    print("KERNEL_OK")
</pallas_src>

<mosaic_0001>
module attributes {stable_mosaic.version = 11 : i64} {
  func.func @_ce_pass_kernel(%arg0: i32, %arg1: i32, %arg2: memref<1xi32, #tpu.memory_space<smem>>, %arg3: memref<1xf32, #tpu.memory_space<smem>>, %arg4: memref<16x128xbf16, #tpu.memory_space<vmem>>, %arg5: memref<16x128xbf16, #tpu.memory_space<vmem>>, %arg6: memref<16x128xbf16, #tpu.memory_space<vmem>>, %arg7: memref<16x1xf32, #tpu.memory_space<vmem>>, %arg8: memref<16x1xf32, #tpu.memory_space<vmem>>, %arg9: memref<16x128xbf16, #tpu.memory_space<vmem>>, %arg10: memref<16x1xf32, #tpu.memory_space<vmem>>, %arg11: memref<16x1xf32, #tpu.memory_space<vmem>>, %arg12: memref<16x1xf32, #tpu.memory_space<vmem>>, %arg13: memref<16x1xi32, #tpu.memory_space<vmem>>) attributes {dimension_semantics = [#tpu.dimension_semantics<parallel>, #tpu.dimension_semantics<arbitrary>], iteration_bounds = array<i64: 2, 2>, scalar_prefetch = 0 : i64, scratch_operands = 5 : i64, tpu.core_type = #tpu.core_type<tc>, window_params = [{transform_indices = @transform_0, window_bounds = array<i64: 1>}, {transform_indices = @transform_1, window_bounds = array<i64: 1>}, {transform_indices = @transform_2, window_bounds = array<i64: 16, 128>}, {transform_indices = @transform_3, window_bounds = array<i64: 16, 128>}, {transform_indices = @transform_4, window_bounds = array<i64: 16, 128>}, {transform_indices = @transform_5, window_bounds = array<i64: 16, 1>}, {transform_indices = @transform_6, window_bounds = array<i64: 16, 1>}]} {
    %c0 = arith.constant 0 : index
    %0 = memref.load %arg2[%c0] : memref<1xi32, #tpu.memory_space<smem>>
    %c0_i32 = arith.constant 0 : i32
    %1 = arith.cmpi eq, %arg1, %c0_i32 : i32
    %2 = arith.extui %1 : i1 to i32
    %c0_i32_0 = arith.constant 0 : i32
    %3 = arith.cmpi ne, %2, %c0_i32_0 : i32
    scf.if %3 {
      %c0_22 = arith.constant 0 : index
      %46 = memref.load %arg3[%c0_22] : memref<1xf32, #tpu.memory_space<smem>>
      %c0_23 = arith.constant 0 : index
      %c0_24 = arith.constant 0 : index
      %47 = vector.load %arg4[%c0_23, %c0_24] : memref<16x128xbf16, #tpu.memory_space<vmem>>, vector<16x128xbf16>
      %48 = arith.extf %47 : vector<16x128xbf16> to vector<16x128xf32>
      %49 = vector.broadcast %46 : f32 to vector<16x128xf32>
      %50 = arith.mulf %48, %49 : vector<16x128xf32>
      %51 = arith.truncf %50 : vector<16x128xf32> to vector<16x128xbf16>
      %c0_25 = arith.constant 0 : index
      %c0_26 = arith.constant 0 : index
      %52 = vector.load %arg9[%c0_25, %c0_26] : memref<16x128xbf16, #tpu.memory_space<vmem>>, vector<16x128xbf16>
      tpu.vector_store %arg9[%c0_25, %c0_26], %51 {strides = array<i32>} : memref<16x128xbf16, #tpu.memory_space<vmem>>, vector<16x128xbf16>,
      %53 = arith.extf %51 : vector<16x128xbf16> to vector<16x128xf32>
      %c0_27 = arith.constant 0 : index
      %c0_28 = arith.constant 0 : index
      %54 = vector.load %arg6[%c0_27, %c0_28] : memref<16x128xbf16, #tpu.memory_space<vmem>>, vector<16x128xbf16>
      %55 = arith.extf %54 : vector<16x128xbf16> to vector<16x128xf32>
      %56 = arith.mulf %53, %55 : vector<16x128xf32>
      %cst_29 = arith.constant dense<0.000000e+00> : vector<16xf32>
      %57 = vector.multi_reduction <add>, %56, %cst_29 [1] : vector<16x128xf32> to vector<16xf32>
      %58 = vector.shape_cast %57 : vector<16xf32> to vector<16x1xf32>
      %c0_30 = arith.constant 0 : index
      %c0_31 = arith.constant 0 : index
      %59 = vector.load %arg12[%c0_30, %c0_31] : memref<16x1xf32, #tpu.memory_space<vmem>>, vector<16x1xf32>
      tpu.vector_store %arg12[%c0_30, %c0_31], %58 {strides = array<i32>} : memref<16x1xf32, #tpu.memory_space<vmem>>, vector<16x1xf32>,
      %cst_32 = arith.constant -1.000000e+30 : f32
      %60 = vector.broadcast %cst_32 : f32 to vector<16x1xf32>
      %c0_33 = arith.constant 0 : index
      %c0_34 = arith.constant 0 : index
      %61 = vector.load %arg10[%c0_33, %c0_34] : memref<16x1xf32, #tpu.memory_space<vmem>>, vector<16x1xf32>
      tpu.vector_store %arg10[%c0_33, %c0_34], %60 {strides = array<i32>} : memref<16x1xf32, #tpu.memory_space<vmem>>, vector<16x1xf32>,
      %cst_35 = arith.constant 0.000000e+00 : f32
      %62 = vector.broadcast %cst_35 : f32 to vector<16x1xf32>
      %c0_36 = arith.constant 0 : index
      %c0_37 = arith.constant 0 : index
      %63 = vector.load %arg11[%c0_36, %c0_37] : memref<16x1xf32, #tpu.memory_space<vmem>>, vector<16x1xf32>
      tpu.vector_store %arg11[%c0_36, %c0_37], %62 {strides = array<i32>} : memref<16x1xf32, #tpu.memory_space<vmem>>, vector<16x1xf32>,
      %c1073741824_i32_38 = arith.constant 1073741824 : i32
      %64 = vector.broadcast %c1073741824_i32_38 : i32 to vector<16x1xi32>
      %c0_39 = arith.constant 0 : index
      %c0_40 = arith.constant 0 : index
      %65 = vector.load %arg13[%c0_39, %c0_40] : memref<16x1xi32, #tpu.memory_space<vmem>>, vector<16x1xi32>
      tpu.vector_store %arg13[%c0_39, %c0_40], %64 {strides = array<i32>} : memref<16x1xi32, #tpu.memory_space<vmem>>, vector<16x1xi32>,
    } else {
    }
    %c0_1 = arith.constant 0 : index
    %c0_2 = arith.constant 0 : index
    %4 = vector.load %arg9[%c0_1, %c0_2] : memref<16x128xbf16, #tpu.memory_space<vmem>>, vector<16x128xbf16>
    %c0_3 = arith.constant 0 : index
    %c0_4 = arith.constant 0 : index
    %5 = vector.load %arg5[%c0_3, %c0_4] : memref<16x128xbf16, #tpu.memory_space<vmem>>, vector<16x128xbf16>
    %6 = tpu.transpose %5, [1, 0] : vector<16x128xbf16> -> vector<128x16xbf16>
    %cst = arith.constant dense<0.000000e+00> : vector<16x16xf32>
    %7 = tpu.matmul %4, %6, %cst {dimension_numbers = #tpu.dot_dimension_numbers<[1], [0], [0], [1], [0, 0, 1, 1], [], []>} : vector<16x128xbf16>, vector<128x16xbf16>, vector<16x16xf32> -> vector<16x16xf32>
    %c16_i32 = arith.constant 16 : i32
    %8 = arith.muli %arg1, %c16_i32 : i32
    %9 = tpu.iota {dimensions = array<i32: 1>} : vector<16x16xi32>
    %10 = vector.broadcast %8 : i32 to vector<16x16xi32>
    %11 = arith.addi %10, %9 : vector<16x16xi32>
    %12 = vector.broadcast %0 : i32 to vector<16x16xi32>
    %13 = arith.cmpi slt, %11, %12 : vector<16x16xi32>
    %cst_5 = arith.constant -1.000000e+30 : f32
    %14 = vector.broadcast %cst_5 : f32 to vector<16x16xf32>
    %15 = arith.select %13, %7, %14 : vector<16x16xi1>, vector<16x16xf32>
    %c0_6 = arith.constant 0 : index
    %c0_7 = arith.constant 0 : index
    %16 = vector.load %arg10[%c0_6, %c0_7] : memref<16x1xf32, #tpu.memory_space<vmem>>, vector<16x1xf32>
    %cst_8 = arith.constant dense<0xFF800000> : vector<16xf32>
    %17 = vector.multi_reduction <maximumf>, %15, %cst_8 [1] : vector<16x16xf32> to vector<16xf32>
    %18 = vector.shape_cast %17 : vector<16xf32> to vector<16x1xf32>
    %19 = arith.maximumf %16, %18 : vector<16x1xf32>
    %20 = vector.broadcast %19 : vector<16x1xf32> to vector<16x16xf32>
    %21 = arith.subf %15, %20 : vector<16x16xf32>
    %22 = math.exp %21 : vector<16x16xf32>
    %23 = arith.subf %16, %19 : vector<16x1xf32>
    %24 = math.exp %23 : vector<16x1xf32>
    %c0_9 = arith.constant 0 : index
    %c0_10 = arith.constant 0 : index
    %25 = vector.load %arg11[%c0_9, %c0_10] : memref<16x1xf32, #tpu.memory_space<vmem>>, vector<16x1xf32>
    %26 = arith.mulf %24, %25 : vector<16x1xf32>
    %cst_11 = arith.constant dense<0.000000e+00> : vector<16xf32>
    %27 = vector.multi_reduction <add>, %22, %cst_11 [1] : vector<16x16xf32> to vector<16xf32>
    %28 = vector.shape_cast %27 : vector<16xf32> to vector<16x1xf32>
    %29 = arith.addf %26, %28 : vector<16x1xf32>
    %c0_12 = arith.constant 0 : index
    %c0_13 = arith.constant 0 : index
    %30 = vector.load %arg11[%c0_12, %c0_13] : memref<16x1xf32, #tpu.memory_space<vmem>>, vector<16x1xf32>
    tpu.vector_store %arg11[%c0_12, %c0_13], %29 {strides = array<i32>} : memref<16x1xf32, #tpu.memory_space<vmem>>, vector<16x1xf32>,
    %31 = vector.broadcast %18 : vector<16x1xf32> to vector<16x16xf32>
    %32 = arith.cmpf oeq, %15, %31 : vector<16x16xf32>
    %33 = arith.andi %32, %13 : vector<16x16xi1>
    %c1073741824_i32 = arith.constant 1073741824 : i32
    %34 = vector.broadcast %c1073741824_i32 : i32 to vector<16x16xi32>
    %35 = arith.select %33, %11, %34 : vector<16x16xi1>, vector<16x16xi32>
    %cst_14 = arith.constant dense<2147483647> : vector<16xi32>
    %36 = vector.multi_reduction <minsi>, %35, %cst_14 [1] : vector<16x16xi32> to vector<16xi32>
    %37 = vector.shape_cast %36 : vector<16xi32> to vector<16x1xi32>
    %38 = arith.cmpf ogt, %18, %16 : vector<16x1xf32>
    %c0_15 = arith.constant 0 : index
    %c0_16 = arith.constant 0 : index
    %39 = vector.load %arg13[%c0_15, %c0_16] : memref<16x1xi32, #tpu.memory_space<vmem>>, vector<16x1xi32>
    %40 = arith.select %38, %37, %39 : vector<16x1xi1>, vector<16x1xi32>
    %c0_17 = arith.constant 0 : index
    %c0_18 = arith.constant 0 : index
    %41 = vector.load %arg13[%c0_17, %c0_18] : memref<16x1xi32, #tpu.memory_space<vmem>>, vector<16x1xi32>
    tpu.vector_store %arg13[%c0_17, %c0_18], %40 {strides = array<i32>} : memref<16x1xi32, #tpu.memory_space<vmem>>, vector<16x1xi32>,
    %c0_19 = arith.constant 0 : index
    %c0_20 = arith.constant 0 : index
    %42 = vector.load %arg10[%c0_19, %c0_20] : memref<16x1xf32, #tpu.memory_space<vmem>>, vector<16x1xf32>
    tpu.vector_store %arg10[%c0_19, %c0_20], %19 {strides = array<i32>} : memref<16x1xf32, #tpu.memory_space<vmem>>, vector<16x1xf32>,
    %c1_i32 = arith.constant 1 : i32
    %43 = arith.cmpi eq, %arg1, %c1_i32 : i32
    %44 = arith.extui %43 : i1 to i32
    %c0_i32_21 = arith.constant 0 : i32
    %45 = arith.cmpi ne, %44, %c0_i32_21 : i32
    scf.if %45 {
      %c16_i32_22 = arith.constant 16 : i32
      %46 = arith.muli %arg0, %c16_i32_22 : i32
      %47 = tpu.iota {dimensions = array<i32: 0>} : vector<16x1xi32>
      %48 = vector.broadcast %46 : i32 to vector<16x1xi32>
      %49 = arith.addi %48, %47 : vector<16x1xi32>
      %50 = vector.broadcast %0 : i32 to vector<16x1xi32>
      %51 = arith.cmpi slt, %49, %50 : vector<16x1xi32>
      %c0_23 = arith.constant 0 : index
      %c0_24 = arith.constant 0 : index
      %52 = vector.load %arg10[%c0_23, %c0_24] : memref<16x1xf32, #tpu.memory_space<vmem>>, vector<16x1xf32>
      %c0_25 = arith.constant 0 : index
      %c0_26 = arith.constant 0 : index
      %53 = vector.load %arg11[%c0_25, %c0_26] : memref<16x1xf32, #tpu.memory_space<vmem>>, vector<16x1xf32>
      %54 = math.log %53 : vector<16x1xf32>
      %55 = arith.addf %52, %54 : vector<16x1xf32>
      %c0_27 = arith.constant 0 : index
      %c0_28 = arith.constant 0 : index
      %56 = vector.load %arg12[%c0_27, %c0_28] : memref<16x1xf32, #tpu.memory_space<vmem>>, vector<16x1xf32>
      %57 = arith.subf %55, %56 : vector<16x1xf32>
      %cst_29 = arith.constant 0.000000e+00 : f32
      %58 = vector.broadcast %cst_29 : f32 to vector<16x1xf32>
      %59 = arith.select %51, %57, %58 : vector<16x1xi1>, vector<16x1xf32>
      %c0_30 = arith.constant 0 : index
      %c0_31 = arith.constant 0 : index
      %60 = vector.load %arg7[%c0_30, %c0_31] : memref<16x1xf32, #tpu.memory_space<vmem>>, vector<16x1xf32>
      tpu.vector_store %arg7[%c0_30, %c0_31], %59 {strides = array<i32>} : memref<16x1xf32, #tpu.memory_space<vmem>>, vector<16x1xf32>,
      %c0_32 = arith.constant 0 : index
      %c0_33 = arith.constant 0 : index
      %61 = vector.load %arg13[%c0_32, %c0_33] : memref<16x1xi32, #tpu.memory_space<vmem>>, vector<16x1xi32>
      %62 = arith.cmpi eq, %61, %49 : vector<16x1xi32>
      %63 = arith.andi %62, %51 : vector<16x1xi1>
      %64 = arith.extui %63 : vector<16x1xi1> to vector<16x1xi32>
      %65 = arith.sitofp %64 : vector<16x1xi32> to vector<16x1xf32>
      %c0_34 = arith.constant 0 : index
      %c0_35 = arith.constant 0 : index
      %66 = vector.load %arg8[%c0_34, %c0_35] : memref<16x1xf32, #tpu.memory_space<vmem>>, vector<16x1xf32>
      tpu.vector_store %arg8[%c0_34, %c0_35], %65 {strides = array<i32>} : memref<16x1xf32, #tpu.memory_space<vmem>>, vector<16x1xf32>,
    } else {
    }
    return
  }
  func.func @transform_0(%arg0: i32, %arg1: i32) -> i32 {
    %c0_i32 = arith.constant 0 : i32
    %c0_i32_0 = arith.constant 0 : i32
    return %c0_i32 : i32
  }
  func.func @transform_1(%arg0: i32, %arg1: i32) -> i32 {
    %c0_i32 = arith.constant 0 : i32
    %c0_i32_0 = arith.constant 0 : i32
    return %c0_i32 : i32
  }
  func.func @transform_2(%arg0: i32, %arg1: i32) -> (i32, i32) {
    %c0_i32 = arith.constant 0 : i32
    %c0_i32_0 = arith.constant 0 : i32
    return %arg0, %c0_i32 : i32, i32
  }
  func.func @transform_3(%arg0: i32, %arg1: i32) -> (i32, i32) {
    %c0_i32 = arith.constant 0 : i32
    %c0_i32_0 = arith.constant 0 : i32
    return %arg1, %c0_i32 : i32, i32
  }
  func.func @transform_4(%arg0: i32, %arg1: i32) -> (i32, i32) {
    %c0_i32 = arith.constant 0 : i32
    %c0_i32_0 = arith.constant 0 : i32
    return %arg0, %c0_i32 : i32, i32
  }
  func.func @transform_5(%arg0: i32, %arg1: i32) -> (i32, i32) {
    %c0_i32 = arith.constant 0 : i32
    %c0_i32_0 = arith.constant 0 : i32
    return %arg0, %c0_i32 : i32, i32
  }
  func.func @transform_6(%arg0: i32, %arg1: i32) -> (i32, i32) {
    %c0_i32 = arith.constant 0 : i32
    %c0_i32_0 = arith.constant 0 : i32
    return %arg0, %c0_i32 : i32, i32
  }
}

</mosaic_0001>

<bundles_post_ra>
// kernel: tpu_custom_call.1
= control target key start
LH: loop header
LB: loop body
LE: loop exit
PB: predicated region body
PF: predicated region fallthrough
CT: control target
= control target key end

     0   :  { %s1595_s0 = inlined_call_operand.<no memory space> [shape: s32[1], index: 0, kind: input, shape index: {}]   ;;  %s1596_s1 = inlined_call_operand.<no memory space> [shape: f32[1], index: 1, kind: input, shape index: {}]   ;;  %s1597_s2 = inlined_call_operand.hbm [shape: bf16[32,128], index: 2, kind: input, shape index: {}]   ;;  %s1598_s3 = inlined_call_operand.hbm [shape: bf16[32,128], index: 3, kind: input, shape index: {}]   ;;  %s1599_s4 = inlined_call_operand.hbm [shape: bf16[32,128], index: 4, kind: input, shape index: {}]   ;;  %s1600_s5 = inlined_call_operand.vmem [shape: f32[32,1], index: 5, kind: output, shape index: {0}]   ;;  %s1601_s6 = inlined_call_operand.vmem [shape: f32[32,1], index: 6, kind: output, shape index: {1}]  }
   0x1   :  { %1616 = sst [smem:[#allocation22_spill]] %s1598_s3 }
   0x2   :  { %12 = sst [smem:[#allocation7]] %s1595_s0 }
   0x3   :  { %13 = sst [smem:[#allocation8]] %s1596_s1 }
   0x4   :  { %14 = vsyncpa [#allocation10], 0 }
   0x5   :  { %16 = vsyncpa [#allocation10 + $0x1], 0 }
   0x6   :  { %17 = vsyncpa [#allocation12], 0 }
   0x7   :  { %19 = vsyncpa [#allocation12 + $0x1], 0  ;;  %s1191_s25 = smov 0   ;;  %s1193_s26 = smov 0  }
   0x8   :  { %s1195_s27 = smov 0   ;;  %s1197_s28 = smov 0  }
   0x9   :  { %s1199_s29 = smov 0   ;;  %s1201_s30 = smov 0  }
   0xa   :  { %s1203_s0 = smov 0   ;;  %s1205_s7 = smov 0  }
   0xb   :  { %s1207_s1 = smov 0   ;;  %s1209_s8 = smov 0  }
   0xc   :  { %s1211_s9 = smov 0  }
   0xd LB: > { %1617 = sst [smem:[#allocation17_spill]] %s1128_s1  ;;  %s1602_s10 = sadd.s32 4294967295, %s1136_s9   ;;  %s1136_s9 = sphi %s1211_s9, %s25_s9   ;;  %s1132_s8 = sphi %s1209_s8, %s1644_s8   ;;  %s1128_s1 = sphi %s1207_s1, %s1643_s1   ;;  %s1124_s7 = sphi %s1205_s7, %s1652_s7   ;;  %s1120_s0 = sphi %s1203_s0, %s1651_s0   ;;  %s1116_s30 = sphi %s1201_s30, %s1650_s30   ;;  %s1112_s29 = sphi %s1199_s29, %s1649_s29   ;;  %s1108_s28 = sphi %s1197_s28, %s1648_s28   ;;  %s1104_s27 = sphi %s1195_s27, %s1647_s27   ;;  %s1100_s26 = sphi %s1193_s26, %s1646_s26   ;;  %s1096_s25 = sphi %s1191_s25, %s1645_s25  }
   0xe   : > { %1618 = sst [smem:[#allocation18_spill]] %s1132_s8  ;;  %s34_s11 = sadd.s32 1, %s1128_s1 }
   0xf   : > { %p1246_p0 = scmp.ge.s32.totalorder %s34_s11, 2  ;;  %p1604_p1 = scmp.eq.s32.totalorder %s1136_s9, 0 }
  0x10   : > { %p1253_p2 = scmp.eq.s32.totalorder %s1602_s10, 0  ;;  %s112_s14 = sadd.s32 1, %s1104_s27 }
  0x11   : > { %s1654_s11 = smov (%p1246_p0, %s34_s11), 0  ;;  %p119_p3 = scmp.ne.s32.totalorder %s1104_s27, %s1100_s26 }
  0x12   : > { %s1620_s13 = scalar_select %p1253_p2, 1, 0 }
  0x13   : > { %1621 = sst [smem:[#allocation19_spill]] %s1654_s11  ;;  %p125_p4 = scmp.ne.s32.totalorder %s1100_s26, %s1096_s25 }
  0x14   : > { %s109_s15 = ssub.s32 %s1128_s1, %s1654_s11  ;;  %p121_p6 = por %p119_p3, %p1604_p1 }
  0x15   : > { %p110_p5 = scmp.eq.s32.totalorder %s109_s15, 0  ;;  %p1271_p7 = por %p125_p4, %p1253_p2 }
  0x16   : > { %p1603_p8 = scmp.lt.s32.totalorder %s1136_s9, 4  ;;  %s254_s18 = sand.u32 1, %s1136_s9  }
  0x17   : > { %s1622_s16 = scalar_select %p1271_p7, 1, 0 }
  0x18   : > { %s1277_s17 = scalar_select %p110_p5, %s1104_s27, %s112_s14  }
  0x19   : > { %s256_s19 = sand.u32 1, %s1104_s27   ;;  %s801_s21 = sshll.u32 %s1128_s1, 7 }
  0x1a   : > { %s777_s20 = sshll.u32 %s256_s19, 3  ;;  %s1623_s3 = sld [smem:[#allocation22_spill]] }
  0x1b   : > { %s258_s25 = scalar_lea.vmem [#allocation11], %s777_s20  ;;  %p1291_p9 = pnand %p1603_p8, %p121_p6 }
  0x1c   : > { %s265_s15 = sshll.u32 %s258_s25, 4  ;;  %s1297_s19 = scalar_lea.sflag [#allocation12], %s254_s18  ;;  %s1287_s15 = int_to_ptr.vmem [resolvable:$true] %s265_s15 }
  0x1d   : > { %p950_p13 = pneg %p1291_p9 }
  0x20   : > { %s1285_s24 = scalar_lea.hbm %s1623_s3, %s801_s21  ;;  %s953_s23 = scalar_lea.hbm %s1623_s3, 256 }
  0x21   : > { %s948_s21 = scalar_lea.hbm %s1285_s24, 128  ;;  %p954_p5 = scmp.lt.u32.totalorder %s1285_s24, %s1623_s3 }
  0x22   : > { %p949_p12 = scmp.ne.s32.totalorder %s1285_s24, %s948_s21  ;;  %p955_p6 = scmp.lt.u32.totalorder %s953_s23, %s948_s21 }
  0x23   : > { %p957_p1 = scmp.lt.u32.totalorder %s948_s21, %s1285_s24 }
  0x24   : > { %p951_p3 = pnand %p950_p13, %p949_p12  ;;  %p956_p8 = por %p955_p6, %p954_p5 }
  0x26   : > { %p952_p4 = pneg %p951_p3  ;;  %p958_p10 = por %p957_p1, %p956_p8 }
  0x28   : > { %p959_p11 = pnand %p958_p10, %p952_p4 }
  0x2a   : > { %962 = shalt.err (!%p959_p11)
}
  0x2b   : > { %s963_s18 = scalar_lea.vmem %s1287_s15, 128  ;;  %s1138_s20 = smov [#allocation11]  }
  0x2c   : > { %p964_p12 = scmp.ne.s32.totalorder %s1287_s15, %s963_s18  ;;  %s968_s22 = sshll.u32 %s1138_s20, 4  ;;  %s969_s22 = int_to_ptr.vmem [resolvable:$false] %s968_s22 }
  0x2d   : > { %s970_s10 = scalar_lea.vmem %s969_s22, 256  ;;  %p971_p2 = scmp.lt.s32.totalorder %s1287_s15, %s969_s22 }
  0x2e   : > { %p966_p3 = pnand %p964_p12, %p950_p13  ;;  %p972_p5 = scmp.lt.s32.totalorder %s970_s10, %s963_s18 }
  0x30   : > { %p967_p7 = pneg %p966_p3  ;;  %p973_p6 = por %p972_p5, %p971_p2 }
  0x32   : > { %p974_p1 = pnand %p973_p6, %p967_p7 }
  0x34   : > { %977 = shalt.err (!%p974_p1)
}
  0x35   : > { %s1607_s21 = smov 64   ;;  %s1609_s23 = smov 4  }
  0x36   : > { %831 = dma.hbm_to_vmem [thread:$0]  (!%p1291_p9), %s1285_s24, 128, %s1287_s15, %s1297_s19, %s1607_s21, %s1607_s21, %s1609_s23  }
  0x37   : > { %p1625_p2 = scmp.lt.s32.totalorder %s1136_s9, 5  ;;  %p1626_p7 = scmp.ge.s32.totalorder %s1136_s9, 1 }
  0x38   : > { %s37_s18 = sadd.s32 1, %s1132_s8  ;;  %s86_s20 = sadd.s32 1, %s1116_s30 }
  0x39   : > { %p1332_p8 = pnand %p1626_p7, %p1625_p2  ;;  %s1656_s18 = smov (!%p1246_p0, %s37_s18), %s1132_s8 }
  0x3a   : > { %p93_p10 = scmp.ne.s32.totalorder %s1116_s30, %s1112_s29  ;;  %p99_p11 = scmp.ne.s32.totalorder %s1112_s29, %s1108_s28 }
  0x3b   : > { %p39_p13 = scmp.ge.s32.totalorder %s1656_s18, 2  ;;  %s233_s14 = sand.u32 1, %s1116_s30  }
  0x3c   : > { %p1628_p4 = scmp.eq.s32.totalorder %s1136_s9, 0  ;;  %p1629_p3 = scmp.ne.s32.totalorder %s1620_s13, 0 }
  0x3d   : > { %s1658_s18 = smov (%p39_p13, %s1656_s18), 0  ;;  %s774_s15 = sshll.u32 %s233_s14, 3 }
  0x3e   : > { %p95_p12 = por %p1628_p4, %p93_p10  ;;  %p1350_p9 = por %p1629_p3, %p99_p11 }
  0x3f   : > { %1631 = sst [smem:[#allocation20_spill]] %s1658_s18  ;;  %s83_s22 = ssub.s32 %s1132_s8, %s1658_s18 }
  0x40   : > { %s1630_s24 = scalar_select %p1350_p9, 1, 0 }
  0x41   : > { %p84_p5 = scmp.eq.s32.totalorder %s83_s22, 0  ;;  %s800_s12 = sshll.u32 %s1132_s8, 7 }
  0x42   : > { %s1362_s28 = scalar_lea.hbm %s1597_s2, %s800_s12  ;;  %s237_s13 = scalar_lea.vmem [#allocation9], %s774_s15 }
  0x43   : > { %s244_s23 = sshll.u32 %s237_s13, 4  ;;  %p1633_p0 = scmp.lt.s32.totalorder %s1136_s9, 4  ;;  %s1367_s23 = int_to_ptr.vmem [resolvable:$true] %s244_s23 }
  0x44   : > { %s1365_s3 = scalar_select %p84_p5, %s1116_s30, %s86_s20  }
  0x45   : > { %p1371_p6 = pnand %p1633_p0, %p95_p12  ;;  %s1378_s21 = scalar_lea.hbm %s1599_s4, %s800_s12 }
  0x46   : > { %1632 = sst [smem:[#allocation21_spill]] %s1365_s3  ;;  %s279_s10 = scalar_lea.vmem [#allocation13], %s774_s15 }
  0x47   : > { %s1380_s8 = sshll.u32 %s279_s10, 4  ;;  %s1382_s20 = scalar_lea.sflag [#allocation10], %s233_s14  ;;  %s1414_s8 = int_to_ptr.vmem [resolvable:$true] %s1380_s8 }
  0x48   : > { %s978_s13 = scalar_lea.hbm %s1362_s28, 128  ;;  %p980_p2 = pneg %p1371_p6 }
  0x49   : > { %p979_p1 = scmp.ne.s32.totalorder %s1362_s28, %s978_s13  ;;  %s983_s11 = scalar_lea.hbm %s1597_s2, 256 }
  0x4a   : > { %p984_p11 = scmp.lt.u32.totalorder %s1362_s28, %s1597_s2  ;;  %p985_p13 = scmp.lt.u32.totalorder %s983_s11, %s978_s13 }
  0x4b   : > { %p981_p7 = pnand %p980_p2, %p979_p1  ;;  %p987_p12 = scmp.lt.u32.totalorder %s978_s13, %s1362_s28 }
  0x4c   : > { %p986_p4 = por %p985_p13, %p984_p11 }
  0x4d   : > { %p982_p10 = pneg %p981_p7 }
  0x4e   : > { %p988_p3 = por %p987_p12, %p986_p4 }
  0x50   : > { %p989_p5 = pnand %p988_p3, %p982_p10 }
  0x52   : > { %992 = shalt.err (!%p989_p5)
}
  0x53   : > { %s993_s14 = scalar_lea.vmem %s1367_s23, 128  ;;  %s1141_s3 = smov [#allocation9]  }
  0x54   : > { %p994_p0 = scmp.ne.s32.totalorder %s1367_s23, %s993_s14  ;;  %s998_s1 = sshll.u32 %s1141_s3, 4  ;;  %s999_s1 = int_to_ptr.vmem [resolvable:$false] %s998_s1 }
  0x55   : > { %s1000_s15 = scalar_lea.vmem %s999_s1, 256  ;;  %p1001_p9 = scmp.lt.s32.totalorder %s1367_s23, %s999_s1 }
  0x56   : > { %p996_p1 = pnand %p994_p0, %p980_p2  ;;  %p1002_p11 = scmp.lt.s32.totalorder %s1000_s15, %s993_s14 }
  0x58   : > { %p997_p7 = pneg %p996_p1  ;;  %p1003_p13 = por %p1002_p11, %p1001_p9 }
  0x5a   : > { %p1004_p4 = pnand %p1003_p13, %p997_p7 }
  0x5c   : > { %1007 = shalt.err (!%p1004_p4)
}
  0x5d   : > { %s1635_s10 = smov 4   ;;  %s1636_s13 = smov 64  }
  0x5e   : > { %828 = dma.hbm_to_vmem [thread:$0]  (!%p1371_p6), %s1362_s28, 128, %s1367_s23, %s1382_s20, %s1636_s13, %s1636_s13, %s1635_s10  }
  0x5f   : > { %s1008_s11 = scalar_lea.hbm %s1378_s21, 128  ;;  %s1013_s14 = scalar_lea.hbm %s1599_s4, 256 }
  0x60   : > { %p1009_p9 = scmp.ne.s32.totalorder %s1378_s21, %s1008_s11  ;;  %p1014_p3 = scmp.lt.u32.totalorder %s1378_s21, %s1599_s4 }
  0x61   : > { %p1015_p5 = scmp.lt.u32.totalorder %s1013_s14, %s1008_s11  ;;  %p1017_p1 = scmp.lt.u32.totalorder %s1008_s11, %s1378_s21 }
  0x62   : > { %p1011_p10 = pnand %p1009_p9, %p980_p2 }
  0x63   : > { %p1016_p0 = por %p1015_p5, %p1014_p3 }
  0x64   : > { %p1012_p12 = pneg %p1011_p10 }
  0x65   : > { %p1018_p7 = por %p1017_p1, %p1016_p0 }
  0x67   : > { %p1019_p11 = pnand %p1018_p7, %p1012_p12 }
  0x69   : > { %1022 = shalt.err (!%p1019_p11)
}
  0x6a   : > { %s1023_s23 = scalar_lea.vmem %s1414_s8, 128  ;;  %s1142_s28 = smov [#allocation13]  }
  0x6b   : > { %p1024_p13 = scmp.ne.s32.totalorder %s1414_s8, %s1023_s23  ;;  %s1028_s20 = sshll.u32 %s1142_s28, 4  ;;  %s1029_s20 = int_to_ptr.vmem [resolvable:$false] %s1028_s20 }
  0x6c   : > { %s1030_s15 = scalar_lea.vmem %s1029_s20, 256  ;;  %p1031_p10 = scmp.lt.s32.totalorder %s1414_s8, %s1029_s20 }
  0x6d   : > { %p1026_p4 = pnand %p1024_p13, %p980_p2  ;;  %p1032_p3 = scmp.lt.s32.totalorder %s1030_s15, %s1023_s23 }
  0x6f   : > { %p1027_p9 = pneg %p1026_p4  ;;  %p1033_p5 = por %p1032_p3, %p1031_p10 }
  0x71   : > { %p1034_p0 = pnand %p1033_p5, %p1027_p9 }
  0x73   : > { %1037 = shalt.err (!%p1034_p0)
}
  0x74   : > { %834 = dma.hbm_to_vmem [thread:$0]  (!%p1371_p6), %s1378_s21, 128, %s1414_s8, %s1297_s19, %s1636_s13, %s1636_s13, %s1635_s10  }
  0x75   : > { %298 = sbr.rel (%p1332_p8) target bundleno = 1023 (0x3ff), region = 40  ;;  %s300_s11 = sand.u32 (!%p1332_p8), 1, %s1112_s29  }
  0x76   : > { %s1446_s22 = sshll.u32 (!%p1332_p8), %s300_s11, 3  ;;  %s301_s12 = scalar_lea.sflag (!%p1332_p8), [#allocation10], %s300_s11 }
  0x77   : > { %s304_s14 = scalar_lea.vmem (!%p1332_p8), [#allocation9], %s1446_s22  ;;  %p1637_p2 = scmp.ne.s32.totalorder (!%p1332_p8), %s1630_s24, 0 }
  0x7c   : > { %1083 = dma.done.wait (%p1637_p2), %s301_s12, 128  }
  0x7d   : > { %1085 = vsyncadd (%p1637_p2), %s301_s12, 4294967168  ;;  %s1638_s18 = sadd.s32 4294967295, %s1136_s9   ;;  %s311_s19 = sand.u32 1, %s1100_s26  }
  0x7e   : > { %s309_s8 = sand.u32 1, %s1638_s18   ;;  %s1456_s25 = sshll.u32 %s311_s19, 3 }
  0x7f   : > { %s310_s21 = scalar_lea.sflag [#allocation12], %s309_s8  ;;  %s313_s10 = scalar_lea.vmem [#allocation11], %s1456_s25 }
  0x80   : > { %p1639_p8 = scmp.ne.s32.totalorder %s1622_s16, 0 }
  0x82   : > { %1087 = dma.done.wait (%p1639_p8), %s310_s21, 128  }
  0x83   : > { %1089 = vsyncadd (%p1639_p8), %s310_s21, 4294967168  ;;  %s322_s13 = scalar_lea.vmem [#allocation13], %s1446_s22 }
  0x84   : > { %1091 = dma.done.wait (%p1637_p2), %s310_s21, 128  }
  0x85   : > { %1093 = vsyncadd (%p1637_p2), %s310_s21, 4294967168  ;;  %s787_s3 = sshll.u32 %s1124_s7, 1  ;;  %s1469_s1 = sld [smem:[#allocation7]] }
  0x86   : > { %p370_p6 = scmp.lt.s32.totalorder %s787_s3, 3  ;;  %p791_p12 = scmp.ne.s32.totalorder %s1120_s0, 0 }
  0x87   : > { %s387_s24 = sld [smem:[#allocation8]] (!%p791_p12)  ;;  %v804_v0 = vld [vmem:[%s304_s14] sm:$0xff] (!%p791_p12)   ;;  %vm409_vm0 = vcmask (!%p791_p12), 7168   ;;  %v1143_v1 = vmov (!%p791_p12), 0.0   ;;  %v1144_v4 = vmov (!%p791_p12), -1e+30  }
  0x88   : > { %s1660_s3 = smov (!%p370_p6, %s787_s3), 3  ;;  %386 = sbr.rel (%p791_p12) target bundleno = 297 (0x129), region = 56 }
  0x89   : > { %s788_s23 = sshll.u32 %s1660_s3, 3  ;;  %414 = vst.msk [vmem:[#allocation4] sm:$0xff] (!%p791_p12), %vm409_vm0, %v1143_v1  ;;  %415 = vst.msk [vmem:[#allocation4 + $0x8] sm:$0xff] (!%p791_p12), %vm409_vm0, %v1143_v1  ;;  %v805_v2 = vunpack.c.l.bf16 (!%p791_p12), %v804_v0  ;;  %v806_v3 = vunpack.c.h.bf16 (!%p791_p12), %v804_v0  ;;  %v1145_v5 = vmov (!%p791_p12), 1073741824   ;;  %v808_v7 = vld [vmem:[%s322_s13] sm:$0xff] (!%p791_p12)  }
  0x8a   : > { %s1474_s16 = scalar_lea.vmem %s1600_s5, %s788_s23  ;;  %s1479_s22 = scalar_lea.vmem %s1601_s6, %s788_s23  ;;  %412 = vst.msk [vmem:[#allocation3] sm:$0xff] (!%p791_p12), %vm409_vm0, %v1144_v4  ;;  %413 = vst.msk [vmem:[#allocation3 + $0x8] sm:$0xff] (!%p791_p12), %vm409_vm0, %v1144_v4  ;;  %v809_v11 = vunpack.c.l.bf16 (!%p791_p12), %v808_v7  ;;  %v810_v14 = vunpack.c.h.bf16 (!%p791_p12), %v808_v7 }
  0x8b   : > { %416 = vst.msk [vmem:[#allocation6] sm:$0xff] (!%p791_p12), %vm409_vm0, %v1145_v5  ;;  %417 = vst.msk [vmem:[#allocation6 + $0x8] sm:$0xff] (!%p791_p12), %vm409_vm0, %v1145_v5 }
  0x8d   : > { %v392_v6 = vstv (!%p791_p12), %s387_s24 }
  0x8e   : > { %v393_v8 = vmul.f32 (!%p791_p12), %v805_v2, %v392_v6  ;;  %v394_v9 = vmul.f32 (!%p791_p12), %v806_v3, %v392_v6 }
  0x90   : > { %v395_v10 = vpack.c.bf16 %v394_v9, %v393_v8 }
  0x92   : > { %v397_v12 = vunpack.c.l.bf16 %v395_v10  ;;  %396 = vst [vmem:[#allocation2] sm:$0xff] %v395_v10  ;;  %v398_v13 = vunpack.c.h.bf16 %v395_v10 }
  0x94   : > { %v403_v15 = vmul.f32 %v809_v11, %v397_v12  ;;  %v404_v16 = vmul.f32 %v810_v14, %v398_v13 }
  0x96   : > { %405 = vadd.xlane.f32.xlu0 %v403_v15 }
  0x9a   : > { %407 = vadd.xlane.f32.xlu0 %v404_v16 }
 0x123   : > { %v406_v17 = vpop.xlane.xlu0 %405 }
 0x124   : > { %410 = vst.msk [vmem:[#allocation5] sm:$0xff] %vm409_vm0, %v406_v17 }
 0x127   : > { %v408_v18 = vpop.xlane.xlu0 %407 }
 0x128   : > { %411 = vst.msk [vmem:[#allocation5 + $0x8] sm:$0xff] %vm409_vm0, %v408_v18 }
 0x129 PF: > { %v935_v19 = vld [vmem:[%s313_s10] sm:$0xff]   ;;  %v1146_v20 = vmov 0.0   ;;  %vm1147_vm1 = vmmov 0   ;;  %v469_v22 = vlaneseq  ;;  %s793_s12 = sshll.u32 %s1120_s0, 4  ;;  %v1495_v26 = vstv %s1469_s1  ;;  %p794_p1 = scmp.ne.s32.totalorder %s1120_s0, 1 }
 0x12a   : > { %813 = vmatprep.subr.bf16.mxu0 %v1146_v20  ;;  %815 = vmatprep.mubr.msk.bf16.mxu0 %vm1147_vm1, %v1146_v20  ;;  %v418_v21 = vld [vmem:[#allocation2] sm:$0xff]  ;;  %v471_v24 = vstv %s793_s12  ;;  %vm479_vm3 = vcmask 130048   ;;  %v1148_v35 = vmov 0   ;;  %vm522_vm4 = vcmask 7168   ;;  %v510_v8 = vld [vmem:[#allocation4] sm:$0xff]  ;;  %s795_s14 = sshll.u32 (!%p794_p1), %s1124_s7, 4 }
 0x12b   : > { %814 = vmatpush3.bf16.xpose.msra.mxu0 %v935_v19  ;;  %v470_v23 = vand.u32 127, %v469_v22  ;;  %933 = vset.pattern.permute.xlu1 %v1148_v35  ;;  %v1504_v36 = vld [vmem:[#allocation3] sm:$0xff]  ;;  %v1515_v39 = vld [vmem:[#allocation3 + $0x8] sm:$0xff] }
 0x12c   : > { %934 = vset.pattern.permute.xlu0 %v1148_v35  ;;  %v563_v16 = vld [vmem:[#allocation6] sm:$0xff] }
 0x12d   : > { %v472_v25 = vadd.s32 %v471_v24, %v470_v23  ;;  %v511_v24 = vld [vmem:[#allocation4 + $0x8] sm:$0xff] }
 0x12f   : > { %vm474_vm2 = vcmp.lt.s32.totalorder %v472_v25, %v1495_v26 }
 0x132   : > { %816 = vmatmul.mubr.bf16.vlgmr.msra.gmra.mrb[0].mxu0 %v418_v21 }
 0x205   : > { %v461_v27 = vpop.f32.mrb[0].mxu0 }
 0x206   : > { %v475_v28 = vsel %vm474_vm2, %v461_v27, -1e+30  ;;  %v817_v29 = vpop.f32.mrb[1].mxu0 }
 0x207   : > { %v464_v30 = vpop.f32.mrb[2].mxu0  ;;  %v480_v31 = vsel %vm479_vm3, %v475_v28, -inf }
 0x208   : > { %v476_v32 = vsel %vm474_vm2, %v464_v30, -1e+30  ;;  %481 = vmax.xlane.f32.xlu0 %v480_v31  ;;  %v818_v33 = vpop.f32.mrb[3].mxu0 }
 0x209   : > { %v483_v34 = vsel %vm479_vm3, %v476_v32, -inf }
 0x20c   : > { %484 = vmax.xlane.f32.xlu0 %v483_v34  ;;  %v577_v34 = vshrl.u32 (!%p794_p1), %v469_v22, 7 }
 0x295   : > { %v1506_v37 = vpop.xlane.xlu0 %481 }
 0x296   : > { %v486_v38 = vmax.f32 %v1504_v36, %v1506_v37  ;;  %vm525_vm5 = vcmp.eq.f32.partialorder %v475_v28, %v1506_v37  ;;  %vm561_vm6 = vcmp.gt.f32.partialorder %v1506_v37, %v1504_v36 }
 0x297   : > { %vm527_vm7 = vmand %vm525_vm5, %vm474_vm2 }
 0x298   : > { %v504_v40 = vsub.f32 %v1504_v36, %v486_v38  ;;  %569 = vst.msk [vmem:[#allocation3] sm:$0xff] %vm522_vm4, %v486_v38  ;;  %490 = vperm.xlu1 %933, %v486_v38   ;;  %v529_v41 = vsel %vm527_vm7, %v472_v25, 1073741824  ;;  %v579_v36 = vstv (!%p794_p1), %s795_s14 }
 0x299   : > { %v1519_v42 = vpop.xlane.xlu0 %484  ;;  %v531_v43 = vsel %vm479_vm3, %v529_v41, 2147483647 }
 0x29a   : > { %v487_v44 = vmax.f32 %v1515_v39, %v1519_v42  ;;  %v533_v45 = vshra.s32 %v531_v43, 16  ;;  %vm526_vm8 = vcmp.eq.f32.partialorder %v476_v32, %v1519_v42  ;;  %v532_v57 = vand.u32 65535, %v531_v43 }
 0x29b   : > { %vm528_vm9 = vmand %vm526_vm8, %vm474_vm2  ;;  %v506_v6 = vmul.f32 1.442695, %v504_v40  ;;  %vm562_vm12 = vcmp.gt.f32.partialorder %v1519_v42, %v1515_v39  ;;  %v578_v40 = vadd.s32 (!%p794_p1), 8, %v577_v34  ;;  %v1149_v43 = vmov (!%p794_p1), 0.0  }
 0x29c   : > { %v505_v46 = vsub.f32 %v1515_v39, %v487_v44  ;;  %570 = vst.msk [vmem:[#allocation3 + $0x8] sm:$0xff] %vm522_vm4, %v487_v44  ;;  %495 = vperm.xlu1 %933, %v487_v44   ;;  %v535_v47 = vcvt.s32.f32 %v533_v45  ;;  %v530_v48 = vsel %vm528_vm9, %v472_v25, 1073741824  ;;  %v534_v59 = vcvt.s32.f32 %v532_v57 }
 0x29d   : > { %v546_v49 = vsel %vm479_vm3, %v530_v48, 2147483647  ;;  %v580_v39 = vadd.s32 (!%p794_p1), %v579_v36, %v577_v34  ;;  %v581_v42 = vadd.s32 (!%p794_p1), %v579_v36, %v578_v40 }
 0x29e   : > { %536 = vmin.xlane.f32.xlu0 %v535_v47  ;;  %v548_v50 = vshra.s32 %v546_v49, 16  ;;  %v547_v0 = vand.u32 65535, %v546_v49  ;;  %v508_v19 = vmul.f32 1.442695, %v505_v46 }
 0x29f   : > { %vm582_vm13 = vcmp.lt.s32.totalorder (!%p794_p1), %v580_v39, %v1495_v26  ;;  %vm583_vm0 = vcmp.lt.s32.totalorder (!%p794_p1), %v581_v42, %v1495_v26  ;;  %v584_v46 = vld [vmem:[#allocation3] sm:$0xff] (!%p794_p1) }
 0x2a0   : > { %v550_v51 = vcvt.s32.f32 %v548_v50  ;;  %v549_v2 = vcvt.s32.f32 %v547_v0  ;;  %v594_v50 = vld [vmem:[#allocation5] sm:$0xff] (!%p794_p1) }
 0x2a3   : > { %v585_v49 = vld [vmem:[#allocation3 + $0x8] sm:$0xff] (!%p794_p1) }
 0x2c0   : > { %551 = vmin.xlane.f32.xlu1 %v550_v51 }
 0x317   : > { %v491_v52 = vpop.permute.xlu1 %490 }
 0x318   : > { %v498_v53 = vsub.f32 %v475_v28, %v491_v52  ;;  %v564_v28 = vld [vmem:[#allocation6 + $0x8] sm:$0xff] }
 0x31a   : > { %v500_v54 = vmul.f32 1.442695, %v498_v53  ;;  %v595_v53 = vld [vmem:[#allocation5 + $0x8] sm:$0xff] (!%p794_p1) }
 0x31b   : > { %v496_v61 = vpop.permute.xlu1 %495 }
 0x31c   : > { %936 = vpow2.f32 %v500_v54  ;;  %v499_v62 = vsub.f32 %v476_v32, %v496_v61 }
 0x31e   : > { %v502_v63 = vmul.f32 1.442695, %v499_v62 }
 0x320   : > { %938 = vpow2.f32 %v502_v63 }
 0x321   : > { %940 = vpow2.f32 %v506_v6 }
 0x322   : > { %942 = vpow2.f32 %v508_v19 }
 0x326   : > { %v937_v55 = vpop.eup %936 }
 0x327   : > { %v514_v56 = vsel %vm479_vm3, %v937_v55, 0.0 }
 0x328   : > { %515 = vadd.xlane.f32.xlu0 %v514_v56 }
 0x32a   : > { %v939_v4 = vpop.eup %938 }
 0x32b   : > { %v537_v58 = vpop.xlane.xlu0 %536  ;;  %v517_v5 = vsel %vm479_vm3, %v939_v4, 0.0  ;;  %v941_v7 = vpop.eup %940 }
 0x32c   : > { %vm538_vm10 = vcmp.eq.f32.partialorder %v535_v47, %v537_v58  ;;  %v512_v9 = vmul.f32 %v941_v7, %v510_v8  ;;  %v543_v12 = vcvt.f32.s32 %v537_v58  ;;  %v943_v21 = vpop.eup %942 }
 0x32d   : > { %v539_v60 = vsel %vm538_vm10, %v534_v59, inf  ;;  %v513_v30 = vmul.f32 %v943_v21, %v511_v24 }
 0x32e   : > { %540 = vmin.xlane.f32.xlu0 %v539_v60  ;;  %v544_v14 = vshll.u32 %v543_v12, 16 }
 0x34d   : > { %v552_v1 = vpop.xlane.xlu1 %551 }
 0x34e   : > { %vm553_vm11 = vcmp.eq.f32.partialorder %v550_v51, %v552_v1  ;;  %v558_v20 = vcvt.f32.s32 %v552_v1 }
 0x34f   : > { %v554_v3 = vsel %vm553_vm11, %v549_v2, inf }
 0x350   : > { %555 = vmin.xlane.f32.xlu0 %v554_v3  ;;  %v559_v25 = vshll.u32 %v558_v20, 16 }
 0x354   : > { %518 = vadd.xlane.f32.xlu0 %v517_v5 }
 0x3b5   : > { %v516_v10 = vpop.xlane.xlu0 %515 }
 0x3b6   : > { %v520_v11 = vadd.f32 %v516_v10, %v512_v9 }
 0x3b8   : > { %523 = vst.msk [vmem:[#allocation4] sm:$0xff] %vm522_vm4, %v520_v11 }
 0x3bb   : > { %v541_v13 = vpop.xlane.xlu0 %540 }
 0x3bc   : > { %v542_v15 = vcvt.f32.s32 %v541_v13 }
 0x3be   : > { %v545_v17 = vadd.s32 %v544_v14, %v542_v15 }
 0x3bf   : > { %v586_v35 = vld [vmem:[#allocation4] sm:$0xff] (!%p794_p1) }
 0x3c0   : > { %v565_v18 = vsel %vm561_vm6, %v545_v17, %v563_v16  ;;  %944 = vlog2.f32 (!%p794_p1), %v586_v35 }
 0x3c1   : > { %567 = vst.msk [vmem:[#allocation6] sm:$0xff] %vm522_vm4, %v565_v18 }
 0x3c8   : > { %v602_v37 = vld [vmem:[#allocation6] sm:$0xff] (!%p794_p1) }
 0x3c9   : > { %vm604_vm14 = vcmp.eq.s32.totalorder (!%p794_p1), %v602_v37, %v580_v39 }
 0x3ca   : > { %vm606_vm15 = vmand (!%p794_p1), %vm604_vm14, %vm582_vm13  ;;  %v945_v45 = vpop.eup (!%p794_p1), %944 }
 0x3cb   : > { %v796_v22 = vsel (!%p794_p1), %vm606_vm15, 1.0, %v1149_v43  ;;  %v589_v48 = vmul.f32 (!%p794_p1), 0.6931472, %v945_v45 }
 0x3cc   : > { %612 = vst.msk [vmem:[%s1479_s22] sm:$0xff] (!%p794_p1), %vm522_vm4, %v796_v22 }
 0x3cd   : > { %v592_v52 = vadd.f32 (!%p794_p1), %v589_v48, %v584_v46 }
 0x3cf   : > { %v596_v55 = vsub.f32 (!%p794_p1), %v592_v52, %v594_v50 }
 0x3d1   : > { %v598_v57 = vsel (!%p794_p1), %vm582_vm13, %v596_v55, 0.0 }
 0x3d2   : > { %600 = vst.msk [vmem:[%s1474_s16] sm:$0xff] (!%p794_p1), %vm522_vm4, %v598_v57 }
 0x3dd   : > { %v556_v23 = vpop.xlane.xlu0 %555 }
 0x3de   : > { %v557_v27 = vcvt.f32.s32 %v556_v23  ;;  %574 = sbr.rel (%p794_p1) target bundleno = 1023 (0x3ff), region = 60 }
 0x3e0   : > { %v560_v29 = vadd.s32 %v559_v25, %v557_v27 }
 0x3e1   : > { %v519_v31 = vpop.xlane.xlu0 %518 }
 0x3e2   : > { %v566_v32 = vsel %vm562_vm12, %v560_v29, %v564_v28  ;;  %v521_v33 = vadd.f32 %v519_v31, %v513_v30 }
 0x3e3   : > { %568 = vst.msk [vmem:[#allocation6 + $0x8] sm:$0xff] %vm522_vm4, %v566_v32 }
 0x3e4   : > { %524 = vst.msk [vmem:[#allocation4 + $0x8] sm:$0xff] %vm522_vm4, %v521_v33 }
 0x3ea   : > { %v603_v41 = vld [vmem:[#allocation6 + $0x8] sm:$0xff] }
 0x3eb   : > { %v587_v38 = vld [vmem:[#allocation4 + $0x8] sm:$0xff]  ;;  %vm605_vm1 = vcmp.eq.s32.totalorder %v603_v41, %v581_v42 }
 0x3ec   : > { %946 = vlog2.f32 %v587_v38  ;;  %vm607_vm2 = vmand %vm605_vm1, %vm583_vm0 }
 0x3ed   : > { %v797_v44 = vsel %vm607_vm2, 1.0, %v1149_v43 }
 0x3ee   : > { %613 = vst.msk [vmem:[%s1479_s22 + $0x8] sm:$0xff] %vm522_vm4, %v797_v44 }
 0x3f6   : > { %v947_v47 = vpop.eup %946 }
 0x3f7   : > { %v591_v51 = vmul.f32 0.6931472, %v947_v47 }
 0x3f9   : > { %v593_v54 = vadd.f32 %v591_v51, %v585_v49 }
 0x3fb   : > { %v597_v56 = vsub.f32 %v593_v54, %v595_v53 }
 0x3fd   : > { %v599_v58 = vsel %vm583_vm0, %v597_v56, 0.0 }
 0x3fe   : > { %601 = vst.msk [vmem:[%s1474_s16 + $0x8] sm:$0xff] %vm522_vm4, %v599_v58 }
 0x3ff PF: > { %s25_s9 = sadd.s32 1, %s1136_s9   ;;  %s1640_s0 = sld [smem:[#allocation21_spill]] }
 0x400   : > { %p22_p7 = scmp.ge.s32.totalorder %s25_s9, 6   ;;  %s1641_s7 = sld [smem:[#allocation17_spill]] }
 0x401   : > { %s1642_s18 = sld [smem:[#allocation18_spill]]  ;;  %s1643_s1 = sld [smem:[#allocation19_spill]] }
 0x402   : > { %s1644_s8 = sld [smem:[#allocation20_spill]]  ;;  %s1645_s25 = smov %s1100_s26 }
 0x403   : > { %s1646_s26 = smov %s1104_s27  ;;  %s1647_s27 = smov %s1277_s17 }
 0x404   : > { %s1648_s28 = smov %s1112_s29  ;;  %s1649_s29 = smov %s1116_s30 }
 0x405   : > { %s1650_s30 = smov %s1640_s0  ;;  %24 = sbr.rel (!%p22_p7) target bundleno = 13 (0xd), region = 124 }
 0x406   : > { %s1651_s0 = smov %s1641_s7 }
 0x407   : > { %s1652_s7 = smov %s1642_s18 }
 0x40c   :  { %653 = vsyncpa [#allocation10], 1 }
 0x40d   :  { %655 = vsyncpa [#allocation10 + $0x1], 1 }
 0x40e   :  { %656 = vsyncpa [#allocation12], 1 }
 0x40f   :  { %658 = vsyncpa [#allocation12 + $0x1], 1 }

</bundles_post_ra>
